<compile_context>
chip_gen: v6e
topology: v6e:2x2x1
jax: 0.10.0
libtpu: 0.0.40
codegen_flags: <defaults>
</compile_context>

<pallas_src>
import functools

import jax
import jax.numpy as jnp
from jax import lax
from jax.experimental import pallas as pl
from jax.experimental.pallas import tpu as pltpu

_IGNORE_INDEX = -100


def _make_ce_kernel(n_heads, weights, tile_s, s_total, ignore_index):
    weights = tuple(float(w) for w in weights)

    def kernel(*refs):
        logit_refs = refs[:n_heads]            # each: (1, C, TILE_S)
        tgt_ref = refs[n_heads]                # (1, 1, TILE_S) int32
        out_ref = refs[n_heads + 1]            # (1, 1, 1, TILE_S) f32 partials

        tgt = tgt_ref[0]                       # (1, TILE_S) int32
        valid = tgt != ignore_index            # (1, TILE_S) bool
        if s_total % tile_s != 0:
            # Ragged last spatial tile: mask lanes past S (edge-block padding
            # holds arbitrary logits / targets).
            lane = lax.broadcasted_iota(jnp.int32, (1, tile_s), 1)
            pos = pl.program_id(1) * tile_s + lane
            valid = jnp.logical_and(valid, pos < s_total)

        total = jnp.zeros((1, tile_s), jnp.float32)
        for k in range(n_heads):
            x = logit_refs[k][0].astype(jnp.float32)             # (C, TILE_S)
            m = jnp.max(x, axis=0, keepdims=True)                # (1, TILE_S)
            xs = x - m                                           # shifted; reused twice
            lse = jnp.log(jnp.sum(jnp.exp(xs), axis=0, keepdims=True))
            cls = lax.broadcasted_iota(jnp.int32, xs.shape, 0)   # (C, TILE_S)
            picked = jnp.sum(jnp.where(cls == tgt, xs, 0.0),
                             axis=0, keepdims=True)              # xs[target]
            total = total + jnp.float32(weights[k]) * (lse - picked)

        out_ref[...] = jnp.where(valid, total, 0.0).reshape(1, 1, 1, tile_s)

    return kernel


def _vmem_capacity_bytes():
    """Physical VMEM per TensorCore; conservative (v7x) fallback."""
    try:
        cap = getattr(pltpu.get_tpu_info(), "vmem_capacity_bytes", None)
        if cap:
            return int(cap)
    except Exception:
        pass
    return 64 * 1024 * 1024


def _choose_tile(S, B, stream_bytes_per_lane, c_max):
    """Lane-tile size (multiple of 128), number of spatial tiles, vmem limit.

    Budget ~3/8 of physical VMEM for the double-buffered streamed bytes plus a
    rough allowance for in-kernel f32 temporaries; ensure >=2 parallel units of
    work for v7x megacore when the problem allows it.
    """
    s_pad128 = ((S + 127) // 128) * 128
    vmem_cap = _vmem_capacity_bytes()
    budget = (vmem_cap * 3) // 8                       # 24 MiB v7x / 48 MiB v5e,v6e
    per_lane = 2 * stream_bytes_per_lane + 8 * c_max * 4
    tile_s = max(128, (budget // per_lane) // 128 * 128)
    tile_s = min(tile_s, s_pad128)
    if B * pl.cdiv(s_pad128, tile_s) < 2 and s_pad128 >= 256:
        # Force at least 2 grid steps so the second TensorCore (v7x) has work.
        tile_s = pl.cdiv(s_pad128, 2 * 128) * 128
    n_tiles = pl.cdiv(s_pad128, tile_s)
    vmem_limit = int(min(vmem_cap - (8 << 20),
                         per_lane * tile_s + (16 << 20)))
    return tile_s, n_tiles, vmem_limit


@functools.partial(jax.jit, static_argnames=("weights", "ignore_index"))
def _weighted_ce_sum(logits_tuple, target, weights, ignore_index=_IGNORE_INDEX):
    """Returns (sum over valid pixels & heads of weights[k]*CE, n_valid)."""
    n_heads = len(logits_tuple)
    B, C, H, W = logits_tuple[0].shape
    for lg in logits_tuple:
        assert lg.shape == (B, C, H, W), "all supervision heads must share shape"
    assert target.shape == (B, H, W)
    S = H * W

    itemsizes = [jnp.dtype(lg.dtype).itemsize for lg in logits_tuple]
    stream_bytes_per_lane = sum(C * it for it in itemsizes) + 4 + 4  # tgt + out
    tile_s, n_tiles, vmem_limit = _choose_tile(S, B, stream_bytes_per_lane, C)

    # Contiguous reshape only (free); native dtype preserved (bf16 stays bf16).
    mats = [lg.reshape(B, C, S) for lg in logits_tuple]
    tgt = target.reshape(B, 1, S).astype(jnp.int32)

    kernel = _make_ce_kernel(n_heads, weights, tile_s, S, ignore_index)

    logits_bytes = sum(B * C * S * it for it in itemsizes)
    cost = pl.CostEstimate(
        flops=int(8 * n_heads * B * C * S),
        transcendentals=int(n_heads * B * (C + 1) * S),
        bytes_accessed=int(logits_bytes + B * S * 4 + B * n_tiles * tile_s * 4),
    )

    partials = pl.pallas_call(
        kernel,
        out_shape=jax.ShapeDtypeStruct((B, n_tiles, 1, tile_s), jnp.float32),
        grid_spec=pltpu.PrefetchScalarGridSpec(
            num_scalar_prefetch=0,
            grid=(B, n_tiles),
            in_specs=(
                [pl.BlockSpec((1, C, tile_s), lambda b, s: (b, 0, s))
                 for _ in range(n_heads)]
                + [pl.BlockSpec((1, 1, tile_s), lambda b, s: (b, 0, s))]
            ),
            out_specs=pl.BlockSpec((1, 1, 1, tile_s), lambda b, s: (b, s, 0, 0)),
        ),
        compiler_params=pltpu.CompilerParams(
            dimension_semantics=("parallel", "parallel"),
            vmem_limit_bytes=vmem_limit,
        ),
        cost_estimate=cost,
    )(*mats, tgt)

    n_valid = jnp.sum(target.astype(jnp.int32) != ignore_index).astype(jnp.float32)
    return jnp.sum(partials), n_valid


def deep_supervision_loss(outputs, target, weights=(0.5, 0.75, 0.875, 1.0)):
    """Mirrors DeepSupervisionLoss.forward (mean-reduced CE, ignore_index=-100)."""
    if isinstance(outputs, (list, tuple)):
        n_out = len(outputs)
        n_used = min(n_out, len(weights))     # zip() semantics of the reference
        total, n_valid = _weighted_ce_sum(
            tuple(outputs[:n_used]), target,
            tuple(float(w) for w in weights[:n_used]))
        return total / n_valid / jnp.float32(n_out)
    else:
        total, n_valid = _weighted_ce_sum((outputs,), target, (1.0,))
        return total / n_valid


def _reference(outputs, target, weights=(0.5, 0.75, 0.875, 1.0)):
    """Pure-JAX reference (matches torch CE incl. ignore_index=-100)."""
    def ce(logits, tgt):
        B, C, H, W = logits.shape
        rows = jnp.transpose(logits, (0, 2, 3, 1)).reshape(-1, C).astype(jnp.float32)
        t = tgt.reshape(-1)
        valid = t != _IGNORE_INDEX
        safe_t = jnp.where(valid, t, 0)
        lse = jax.nn.logsumexp(rows, axis=-1)
        picked = jnp.take_along_axis(rows, safe_t[:, None], axis=-1)[:, 0]
        per = jnp.where(valid, lse - picked, 0.0)
        return jnp.sum(per) / jnp.sum(valid)

    if isinstance(outputs, (list, tuple)):
        loss = sum(w * ce(o, target) for o, w in zip(outputs, weights))
        return loss / len(outputs)
    return ce(outputs, target)


if __name__ == "__main__":
    key = jax.random.PRNGKey(0)
    B, C, H, W = 2, 4, 16, 16
    n_heads = 4

    keys = jax.random.split(key, n_heads + 1)
    outputs = [
        jax.random.normal(keys[i], (B, C, H, W), dtype=jnp.float32)
        for i in range(n_heads)
    ]
    target = jax.random.randint(keys[-1], (B, H, W), 0, C, dtype=jnp.int32)

    # fused multi-head path
    loss = jax.block_until_ready(deep_supervision_loss(outputs, target))
    ref = _reference(outputs, target)
    assert jnp.allclose(loss, ref, rtol=1e-5, atol=1e-5), (loss, ref)

    # single-tensor (non-list) path
    single = jax.block_until_ready(deep_supervision_loss(outputs[0], target))
    single_ref = _reference(outputs[0], target)
    assert jnp.allclose(single, single_ref, rtol=1e-5, atol=1e-5), (single, single_ref)

    # ragged spatial size (S not a multiple of 128, no wrapper-side padding)
    # + ignore_index handling
    k2 = jax.random.split(keys[-1], 3)
    B2, C2, H2, W2 = 1, 3, 10, 10
    out2 = [
        jax.random.normal(k2[0], (B2, C2, H2, W2), dtype=jnp.float32),
        jax.random.normal(k2[1], (B2, C2, H2, W2), dtype=jnp.float32),
    ]
    tgt2 = jax.random.randint(k2[2], (B2, H2, W2), 0, C2, dtype=jnp.int32)
    tgt2 = tgt2.at[0, 0, :3].set(_IGNORE_INDEX)
    loss2 = jax.block_until_ready(
        deep_supervision_loss(out2, tgt2, weights=(0.5, 1.0)))
    ref2 = _reference(out2, tgt2, weights=(0.5, 1.0))
    assert jnp.allclose(loss2, ref2, rtol=1e-5, atol=1e-5), (loss2, ref2)

    print("KERNEL_OK")
</pallas_src>

<mosaic_0001>
module attributes {stable_mosaic.version = 11 : i64} {
  func.func @kernel(%arg0: i32, %arg1: i32, %arg2: memref<1x4x256xf32, #tpu.memory_space<vmem>>, %arg3: memref<1x4x256xf32, #tpu.memory_space<vmem>>, %arg4: memref<1x4x256xf32, #tpu.memory_space<vmem>>, %arg5: memref<1x4x256xf32, #tpu.memory_space<vmem>>, %arg6: memref<1x1x256xi32, #tpu.memory_space<vmem>>, %arg7: memref<1x1x1x256xf32, #tpu.memory_space<vmem>>) attributes {dimension_semantics = [#tpu.dimension_semantics<parallel>, #tpu.dimension_semantics<parallel>], iteration_bounds = array<i64: 2, 1>, scalar_prefetch = 0 : i64, scratch_operands = 0 : i64, tpu.core_type = #tpu.core_type<tc>, window_params = [{transform_indices = @transform_0, window_bounds = array<i64: 1, 4, 256>}, {transform_indices = @transform_1, window_bounds = array<i64: 1, 4, 256>}, {transform_indices = @transform_2, window_bounds = array<i64: 1, 4, 256>}, {transform_indices = @transform_3, window_bounds = array<i64: 1, 4, 256>}, {transform_indices = @transform_4, window_bounds = array<i64: 1, 1, 256>}, {transform_indices = @transform_5, window_bounds = array<i64: 1, 1, 1, 256>}]} {
    %c0 = arith.constant 0 : index
    %c0_0 = arith.constant 0 : index
    %c0_1 = arith.constant 0 : index
    %0 = vector.load %arg6[%c0, %c0_0, %c0_1] : memref<1x1x256xi32, #tpu.memory_space<vmem>>, vector<1x1x256xi32>
    %1 = vector.shape_cast %0 : vector<1x1x256xi32> to vector<1x256xi32>
    %c-100_i32 = arith.constant -100 : i32
    %2 = vector.broadcast %c-100_i32 : i32 to vector<1x256xi32>
    %3 = arith.cmpi ne, %1, %2 : vector<1x256xi32>
    %cst = arith.constant 0.000000e+00 : f32
    %4 = vector.broadcast %cst : f32 to vector<1x256xf32>
    %c0_2 = arith.constant 0 : index
    %c0_3 = arith.constant 0 : index
    %c0_4 = arith.constant 0 : index
    %5 = vector.load %arg2[%c0_2, %c0_3, %c0_4] : memref<1x4x256xf32, #tpu.memory_space<vmem>>, vector<1x4x256xf32>
    %6 = vector.shape_cast %5 : vector<1x4x256xf32> to vector<4x256xf32>
    %cst_5 = arith.constant dense<0xFF800000> : vector<256xf32>
    %7 = vector.multi_reduction <maximumf>, %6, %cst_5 [0] : vector<4x256xf32> to vector<256xf32>
    %8 = vector.shape_cast %7 : vector<256xf32> to vector<1x256xf32>
    %9 = vector.broadcast %8 : vector<1x256xf32> to vector<4x256xf32>
    %10 = arith.subf %6, %9 : vector<4x256xf32>
    %11 = math.exp %10 : vector<4x256xf32>
    %cst_6 = arith.constant dense<0.000000e+00> : vector<256xf32>
    %12 = vector.multi_reduction <add>, %11, %cst_6 [0] : vector<4x256xf32> to vector<256xf32>
    %13 = vector.shape_cast %12 : vector<256xf32> to vector<1x256xf32>
    %14 = math.log %13 : vector<1x256xf32>
    %15 = tpu.iota {dimensions = array<i32: 0>} : vector<4x256xi32>
    %16 = vector.broadcast %1 : vector<1x256xi32> to vector<4x256xi32>
    %17 = arith.cmpi eq, %15, %16 : vector<4x256xi32>
    %cst_7 = arith.constant 0.000000e+00 : f32
    %18 = vector.broadcast %cst_7 : f32 to vector<4x256xf32>
    %19 = arith.select %17, %10, %18 : vector<4x256xi1>, vector<4x256xf32>
    %cst_8 = arith.constant dense<0.000000e+00> : vector<256xf32>
    %20 = vector.multi_reduction <add>, %19, %cst_8 [0] : vector<4x256xf32> to vector<256xf32>
    %21 = vector.shape_cast %20 : vector<256xf32> to vector<1x256xf32>
    %22 = arith.subf %14, %21 : vector<1x256xf32>
    %cst_9 = arith.constant 5.000000e-01 : f32
    %23 = vector.broadcast %cst_9 : f32 to vector<1x256xf32>
    %24 = arith.mulf %23, %22 : vector<1x256xf32>
    %25 = arith.addf %4, %24 : vector<1x256xf32>
    %c0_10 = arith.constant 0 : index
    %c0_11 = arith.constant 0 : index
    %c0_12 = arith.constant 0 : index
    %26 = vector.load %arg3[%c0_10, %c0_11, %c0_12] : memref<1x4x256xf32, #tpu.memory_space<vmem>>, vector<1x4x256xf32>
    %27 = vector.shape_cast %26 : vector<1x4x256xf32> to vector<4x256xf32>
    %cst_13 = arith.constant dense<0xFF800000> : vector<256xf32>
    %28 = vector.multi_reduction <maximumf>, %27, %cst_13 [0] : vector<4x256xf32> to vector<256xf32>
    %29 = vector.shape_cast %28 : vector<256xf32> to vector<1x256xf32>
    %30 = vector.broadcast %29 : vector<1x256xf32> to vector<4x256xf32>
    %31 = arith.subf %27, %30 : vector<4x256xf32>
    %32 = math.exp %31 : vector<4x256xf32>
    %cst_14 = arith.constant dense<0.000000e+00> : vector<256xf32>
    %33 = vector.multi_reduction <add>, %32, %cst_14 [0] : vector<4x256xf32> to vector<256xf32>
    %34 = vector.shape_cast %33 : vector<256xf32> to vector<1x256xf32>
    %35 = math.log %34 : vector<1x256xf32>
    %36 = tpu.iota {dimensions = array<i32: 0>} : vector<4x256xi32>
    %37 = vector.broadcast %1 : vector<1x256xi32> to vector<4x256xi32>
    %38 = arith.cmpi eq, %36, %37 : vector<4x256xi32>
    %cst_15 = arith.constant 0.000000e+00 : f32
    %39 = vector.broadcast %cst_15 : f32 to vector<4x256xf32>
    %40 = arith.select %38, %31, %39 : vector<4x256xi1>, vector<4x256xf32>
    %cst_16 = arith.constant dense<0.000000e+00> : vector<256xf32>
    %41 = vector.multi_reduction <add>, %40, %cst_16 [0] : vector<4x256xf32> to vector<256xf32>
    %42 = vector.shape_cast %41 : vector<256xf32> to vector<1x256xf32>
    %43 = arith.subf %35, %42 : vector<1x256xf32>
    %cst_17 = arith.constant 7.500000e-01 : f32
    %44 = vector.broadcast %cst_17 : f32 to vector<1x256xf32>
    %45 = arith.mulf %44, %43 : vector<1x256xf32>
    %46 = arith.addf %25, %45 : vector<1x256xf32>
    %c0_18 = arith.constant 0 : index
    %c0_19 = arith.constant 0 : index
    %c0_20 = arith.constant 0 : index
    %47 = vector.load %arg4[%c0_18, %c0_19, %c0_20] : memref<1x4x256xf32, #tpu.memory_space<vmem>>, vector<1x4x256xf32>
    %48 = vector.shape_cast %47 : vector<1x4x256xf32> to vector<4x256xf32>
    %cst_21 = arith.constant dense<0xFF800000> : vector<256xf32>
    %49 = vector.multi_reduction <maximumf>, %48, %cst_21 [0] : vector<4x256xf32> to vector<256xf32>
    %50 = vector.shape_cast %49 : vector<256xf32> to vector<1x256xf32>
    %51 = vector.broadcast %50 : vector<1x256xf32> to vector<4x256xf32>
    %52 = arith.subf %48, %51 : vector<4x256xf32>
    %53 = math.exp %52 : vector<4x256xf32>
    %cst_22 = arith.constant dense<0.000000e+00> : vector<256xf32>
    %54 = vector.multi_reduction <add>, %53, %cst_22 [0] : vector<4x256xf32> to vector<256xf32>
    %55 = vector.shape_cast %54 : vector<256xf32> to vector<1x256xf32>
    %56 = math.log %55 : vector<1x256xf32>
    %57 = tpu.iota {dimensions = array<i32: 0>} : vector<4x256xi32>
    %58 = vector.broadcast %1 : vector<1x256xi32> to vector<4x256xi32>
    %59 = arith.cmpi eq, %57, %58 : vector<4x256xi32>
    %cst_23 = arith.constant 0.000000e+00 : f32
    %60 = vector.broadcast %cst_23 : f32 to vector<4x256xf32>
    %61 = arith.select %59, %52, %60 : vector<4x256xi1>, vector<4x256xf32>
    %cst_24 = arith.constant dense<0.000000e+00> : vector<256xf32>
    %62 = vector.multi_reduction <add>, %61, %cst_24 [0] : vector<4x256xf32> to vector<256xf32>
    %63 = vector.shape_cast %62 : vector<256xf32> to vector<1x256xf32>
    %64 = arith.subf %56, %63 : vector<1x256xf32>
    %cst_25 = arith.constant 8.750000e-01 : f32
    %65 = vector.broadcast %cst_25 : f32 to vector<1x256xf32>
    %66 = arith.mulf %65, %64 : vector<1x256xf32>
    %67 = arith.addf %46, %66 : vector<1x256xf32>
    %c0_26 = arith.constant 0 : index
    %c0_27 = arith.constant 0 : index
    %c0_28 = arith.constant 0 : index
    %68 = vector.load %arg5[%c0_26, %c0_27, %c0_28] : memref<1x4x256xf32, #tpu.memory_space<vmem>>, vector<1x4x256xf32>
    %69 = vector.shape_cast %68 : vector<1x4x256xf32> to vector<4x256xf32>
    %cst_29 = arith.constant dense<0xFF800000> : vector<256xf32>
    %70 = vector.multi_reduction <maximumf>, %69, %cst_29 [0] : vector<4x256xf32> to vector<256xf32>
    %71 = vector.shape_cast %70 : vector<256xf32> to vector<1x256xf32>
    %72 = vector.broadcast %71 : vector<1x256xf32> to vector<4x256xf32>
    %73 = arith.subf %69, %72 : vector<4x256xf32>
    %74 = math.exp %73 : vector<4x256xf32>
    %cst_30 = arith.constant dense<0.000000e+00> : vector<256xf32>
    %75 = vector.multi_reduction <add>, %74, %cst_30 [0] : vector<4x256xf32> to vector<256xf32>
    %76 = vector.shape_cast %75 : vector<256xf32> to vector<1x256xf32>
    %77 = math.log %76 : vector<1x256xf32>
    %78 = tpu.iota {dimensions = array<i32: 0>} : vector<4x256xi32>
    %79 = vector.broadcast %1 : vector<1x256xi32> to vector<4x256xi32>
    %80 = arith.cmpi eq, %78, %79 : vector<4x256xi32>
    %cst_31 = arith.constant 0.000000e+00 : f32
    %81 = vector.broadcast %cst_31 : f32 to vector<4x256xf32>
    %82 = arith.select %80, %73, %81 : vector<4x256xi1>, vector<4x256xf32>
    %cst_32 = arith.constant dense<0.000000e+00> : vector<256xf32>
    %83 = vector.multi_reduction <add>, %82, %cst_32 [0] : vector<4x256xf32> to vector<256xf32>
    %84 = vector.shape_cast %83 : vector<256xf32> to vector<1x256xf32>
    %85 = arith.subf %77, %84 : vector<1x256xf32>
    %cst_33 = arith.constant 1.000000e+00 : f32
    %86 = vector.broadcast %cst_33 : f32 to vector<1x256xf32>
    %87 = arith.mulf %86, %85 : vector<1x256xf32>
    %88 = arith.addf %67, %87 : vector<1x256xf32>
    %cst_34 = arith.constant 0.000000e+00 : f32
    %89 = vector.broadcast %cst_34 : f32 to vector<1x256xf32>
    %90 = arith.select %3, %88, %89 : vector<1x256xi1>, vector<1x256xf32>
    %91 = vector.shape_cast %90 : vector<1x256xf32> to vector<1x1x1x256xf32>
    %c0_35 = arith.constant 0 : index
    %c0_36 = arith.constant 0 : index
    %c0_37 = arith.constant 0 : index
    %c0_38 = arith.constant 0 : index
    %92 = vector.load %arg7[%c0_35, %c0_36, %c0_37, %c0_38] : memref<1x1x1x256xf32, #tpu.memory_space<vmem>>, vector<1x1x1x256xf32>
    tpu.vector_store %arg7[%c0_35, %c0_36, %c0_37, %c0_38], %91 {strides = array<i32>} : memref<1x1x1x256xf32, #tpu.memory_space<vmem>>, vector<1x1x1x256xf32>,
    return
  }
  func.func @transform_0(%arg0: i32, %arg1: i32) -> (i32, i32, i32) {
    %c0_i32 = arith.constant 0 : i32
    %c0_i32_0 = arith.constant 0 : i32
    return %arg0, %c0_i32, %arg1 : i32, i32, i32
  }
  func.func @transform_1(%arg0: i32, %arg1: i32) -> (i32, i32, i32) {
    %c0_i32 = arith.constant 0 : i32
    %c0_i32_0 = arith.constant 0 : i32
    return %arg0, %c0_i32, %arg1 : i32, i32, i32
  }
  func.func @transform_2(%arg0: i32, %arg1: i32) -> (i32, i32, i32) {
    %c0_i32 = arith.constant 0 : i32
    %c0_i32_0 = arith.constant 0 : i32
    return %arg0, %c0_i32, %arg1 : i32, i32, i32
  }
  func.func @transform_3(%arg0: i32, %arg1: i32) -> (i32, i32, i32) {
    %c0_i32 = arith.constant 0 : i32
    %c0_i32_0 = arith.constant 0 : i32
    return %arg0, %c0_i32, %arg1 : i32, i32, i32
  }
  func.func @transform_4(%arg0: i32, %arg1: i32) -> (i32, i32, i32) {
    %c0_i32 = arith.constant 0 : i32
    %c0_i32_0 = arith.constant 0 : i32
    return %arg0, %c0_i32, %arg1 : i32, i32, i32
  }
  func.func @transform_5(%arg0: i32, %arg1: i32) -> (i32, i32, i32, i32) {
    %c0_i32 = arith.constant 0 : i32
    %c0_i32_0 = arith.constant 0 : i32
    %c0_i32_1 = arith.constant 0 : i32
    return %arg0, %arg1, %c0_i32, %c0_i32_0 : i32, i32, i32, i32
  }
}

</mosaic_0001>

<bundles_post_ra>
// kernel: _weighted_ce_sum.1
= control target key start
LH: loop header
LB: loop body
LE: loop exit
PB: predicated region body
PF: predicated region fallthrough
CT: control target
= control target key end

     0   :  { %s1004_s18 = smov 0   ;;  %s1006_s19 = smov 0   ;;  %s1171_s0 = inlined_call_operand.vmem [shape: f32[2,4,256], index: 0, kind: input, shape index: {}]   ;;  %s1172_s1 = inlined_call_operand.vmem [shape: f32[2,4,256], index: 1, kind: input, shape index: {}]   ;;  %s1173_s2 = inlined_call_operand.vmem [shape: f32[2,4,256], index: 2, kind: input, shape index: {}]   ;;  %s1174_s3 = inlined_call_operand.vmem [shape: f32[2,4,256], index: 3, kind: input, shape index: {}]   ;;  %s1175_s4 = inlined_call_operand.vmem [shape: s32[2,1,256], index: 4, kind: input, shape index: {}]   ;;  %s1176_s5 = inlined_call_operand.vmem [shape: f32[2,1,1,256], index: 5, kind: output, shape index: {}]  }
   0x1   :  { %s1008_s20 = smov 0  }
   0x2 LB: > { %s27_s21 = sadd.s32 1, %s967_s19  ;;  %p879_p0 = scmp.ge.s32.totalorder %s971_s20, 1  ;;  %s971_s20 = sphi %s1008_s20, %s15_s20   ;;  %s967_s19 = sphi %s1006_s19, %s1178_s19   ;;  %s963_s18 = sphi %s1004_s18, %s1177_s18  }
   0x3   : > { %p29_p1 = scmp.ge.s32.totalorder %s27_s21, 2  ;;  %p275_p2 = scmp.lt.s32.totalorder %s971_s20, 3 }
   0x5   : > { %s1180_s21 = smov (%p29_p1, %s27_s21), 0  ;;  %p276_p3 = pnand %p879_p0, %p275_p2 }
   0x6   : > { %p346_p4 = scmp.lt.s32.totalorder (!%p276_p3), %s963_s18, 1 }
   0x7   : > { %279 = sbr.rel (%p276_p3) target bundleno = 104 (0x68), region = 40 }
   0xc   : > { %s1182_s18 = smov (!%p346_p4, %s963_s18), 1  ;;  %v451_v0 = vlaneseq  ;;  %vm408_vm0 = vcmask 1043456  }
   0xd   : > { %s892_s22 = sshll.u32 %s1182_s18, 3  ;;  %s888_s10 = sshll.u32 %s1182_s18, 1 }
   0xe   : > { %s353_s25 = scalar_lea.vmem %s1171_s0, %s892_s22  ;;  %s363_s28 = scalar_lea.vmem %s1172_s1, %s892_s22  ;;  %v1037_v2 = vshrl.u32 %v451_v0, 7  ;;  %vm720_vm4 = vcmp.lt.s32.totalorder %v451_v0, 256 }
   0xf   : > { %s373_s6 = scalar_lea.vmem %s1173_s2, %s892_s22  ;;  %v1034_v1 = vld [vmem:[%s353_s25] sm:$0xff]  ;;  %s383_s9 = scalar_lea.vmem %s1174_s3, %s892_s22 }
  0x10   : > { %v1039_v3 = vld [vmem:[%s363_s28] sm:$0xff]  ;;  %v406_v4 = vcombine.high %v1034_v1, %v1034_v1  ;;  %v409_v5 = vsel %vm408_vm0, %v1034_v1, -inf  ;;  %v455_v19 = vsub.s32 0, %v1037_v2  ;;  %s392_s13 = scalar_lea.vmem %s1175_s4, %s888_s10  ;;  %v459_v58 = vsub.s32 1, %v1037_v2  ;;  %s401_s16 = scalar_lea.vmem %s1176_s5, %s888_s10 }
  0x11   : > { %v490_v6 = vcombine.high %v1039_v3, %v1039_v3  ;;  %v492_v7 = vsel %vm408_vm0, %v1039_v3, -inf  ;;  %v1052_v8 = vld [vmem:[%s373_s6] sm:$0xff]  ;;  %v410_v9 = vrot.slane %v409_v5, 4 }
  0x12   : > { %v493_v10 = vrot.slane %v492_v7, 4  ;;  %v561_v11 = vcombine.high %v1052_v8, %v1052_v8  ;;  %v563_v12 = vsel %vm408_vm0, %v1052_v8, -inf  ;;  %v416_v13 = vsel %vm408_vm0, %v406_v4, -inf  ;;  %v1060_v18 = vld [vmem:[%s383_s9] sm:$0xff] }
  0x13   : > { %v411_v14 = vmax.f32 %v409_v5, %v410_v9  ;;  %v417_v15 = vrot.slane %v416_v13, 4  ;;  %v499_v17 = vsel %vm408_vm0, %v490_v6, -inf  ;;  %v564_v21 = vrot.slane %v563_v12, 4  ;;  %v1075_v42 = vld [vmem:[%s392_s13] sm:$0x3] }
  0x14   : > { %v494_v16 = vmax.f32 %v492_v7, %v493_v10  ;;  %v500_v20 = vrot.slane %v499_v17, 4  ;;  %v570_v25 = vsel %vm408_vm0, %v561_v11, -inf  ;;  %v632_v29 = vcombine.high %v1060_v18, %v1060_v18 }
  0x15   : > { %v412_v22 = vrot.slane %v411_v14, 2  ;;  %v418_v23 = vmax.f32 %v416_v13, %v417_v15  ;;  %v565_v27 = vmax.f32 %v563_v12, %v564_v21  ;;  %v571_v28 = vrot.slane %v570_v25, 4 }
  0x16   : > { %v495_v24 = vrot.slane %v494_v16, 2  ;;  %v501_v26 = vmax.f32 %v499_v17, %v500_v20  ;;  %v634_v33 = vsel %vm408_vm0, %v1060_v18, -inf  ;;  %v641_v41 = vsel %vm408_vm0, %v632_v29, -inf }
  0x17   : > { %v413_v30 = vmax.f32 %v411_v14, %v412_v22  ;;  %v419_v31 = vrot.slane %v418_v23, 2  ;;  %v566_v35 = vrot.slane %v565_v27, 2  ;;  %v572_v36 = vmax.f32 %v570_v25, %v571_v28 }
  0x18   : > { %v496_v32 = vmax.f32 %v494_v16, %v495_v24  ;;  %v502_v34 = vrot.slane %v501_v26, 2  ;;  %v635_v37 = vrot.slane %v634_v33, 4  ;;  %v642_v50 = vrot.slane %v641_v41, 4 }
  0x19   : > { %v414_v38 = vrot.slane %v413_v30, 1  ;;  %v420_v39 = vmax.f32 %v418_v23, %v419_v31  ;;  %v567_v44 = vmax.f32 %v565_v27, %v566_v35  ;;  %v573_v45 = vrot.slane %v572_v36, 2 }
  0x1a   : > { %v497_v40 = vrot.slane %v496_v32, 1  ;;  %v503_v43 = vmax.f32 %v501_v26, %v502_v34  ;;  %v636_v46 = vmax.f32 %v634_v33, %v635_v37  ;;  %v1078_v56 = vrot.slane %v1075_v42, %v455_v19 }
  0x1b   : > { %v415_v47 = vmax.f32 %v413_v30, %v414_v38  ;;  %v421_v48 = vrot.slane %v420_v39, 1  ;;  %v568_v52 = vrot.slane %v567_v44, 1  ;;  %v574_v53 = vmax.f32 %v572_v36, %v573_v45 }
  0x1c   : > { %v498_v49 = vmax.f32 %v496_v32, %v497_v40  ;;  %v504_v51 = vrot.slane %v503_v43, 1  ;;  %v637_v54 = vrot.slane %v636_v46, 2  ;;  %v643_v57 = vmax.f32 %v641_v41, %v642_v50 }
  0x1d   : > { %v422_v55 = vmax.f32 %v420_v39, %v421_v48  ;;  %v575_v60 = vrot.slane %v574_v53, 1  ;;  %v569_v63 = vmax.f32 %v567_v44, %v568_v52  ;;  %vm461_vm1 = vcmp.eq.s32.totalorder %v1037_v2, %v1078_v56 }
  0x1e   : > { %v505_v59 = vmax.f32 %v503_v43, %v504_v51  ;;  %v638_v61 = vmax.f32 %v636_v46, %v637_v54  ;;  %v644_v4 = vrot.slane %v643_v57, 2  ;;  %v1085_v10 = vrot.slane %v1075_v42, %v459_v58 }
  0x1f   : > { %v425_v62 = vcombine.low %v415_v47, %v422_v55  ;;  %v576_v6 = vmax.f32 %v574_v53, %v575_v60  ;;  %vm403_vm3 = vcmp.ne.s32.totalorder %v1075_v42, 4294967196 }
  0x20   : > { %v508_v5 = vcombine.low %v498_v49, %v505_v59  ;;  %v645_v9 = vmax.f32 %v643_v57, %v644_v4  ;;  %v639_v12 = vrot.slane %v638_v61, 1  ;;  %vm462_vm2 = vcmp.eq.s32.totalorder %v1037_v2, %v1085_v10 }
  0x21   : > { %v427_v7 = vsub.f32 %v1034_v1, %v425_v62  ;;  %v579_v14 = vcombine.low %v569_v63, %v576_v6 }
  0x22   : > { %v510_v11 = vsub.f32 %v1039_v3, %v508_v5  ;;  %v646_v17 = vrot.slane %v645_v9, 1  ;;  %v640_v20 = vmax.f32 %v638_v61, %v639_v12 }
  0x23   : > { %v428_v13 = vmul.f32 1.442695, %v427_v7  ;;  %v466_v15 = vsel %vm461_vm1, %v427_v7, 0.0  ;;  %v464_v1 = vcombine.high %v427_v7, %v427_v7  ;;  %v581_v22 = vsub.f32 %v1052_v8, %v579_v14 }
  0x24   : > { %v511_v16 = vmul.f32 1.442695, %v510_v11  ;;  %v537_v19 = vsel %vm461_vm1, %v510_v11, 0.0  ;;  %v535_v3 = vcombine.high %v510_v11, %v510_v11  ;;  %v468_v21 = vsel %vm408_vm0, %v466_v15, 0.0 }
  0x25   : > { %925 = vpow2.f32 %v428_v13  ;;  %v539_v23 = vsel %vm408_vm0, %v537_v19, 0.0  ;;  %v647_v24 = vmax.f32 %v645_v9, %v646_v17  ;;  %v467_v25 = vsel %vm462_vm2, %v464_v1, 0.0 }
  0x26   : > { %927 = vpow2.f32 %v511_v16  ;;  %v582_v26 = vmul.f32 1.442695, %v581_v22  ;;  %v469_v27 = vrot.slane %v468_v21, 4  ;;  %v538_v28 = vsel %vm462_vm2, %v535_v3, 0.0 }
  0x27   : > { %v650_v29 = vcombine.low %v640_v20, %v647_v24  ;;  %v540_v30 = vrot.slane %v539_v23, 4  ;;  %v475_v31 = vsel %vm408_vm0, %v467_v25, 0.0  ;;  %v546_v8 = vsel %vm408_vm0, %v538_v28, 0.0 }
  0x28   : > { %929 = vpow2.f32 %v582_v26  ;;  %v470_v32 = vadd.f32 %v469_v27, %v468_v21  ;;  %v476_v34 = vrot.slane %v475_v31, 4  ;;  %v547_v36 = vrot.slane %v546_v8, 4 }
  0x29   : > { %v1108_v33 = vsub.f32 %v1060_v18, %v650_v29  ;;  %v541_v35 = vadd.f32 %v540_v30, %v539_v23  ;;  %v606_v38 = vcombine.high %v581_v22, %v581_v22  ;;  %v608_v41 = vsel %vm461_vm1, %v581_v22, 0.0 }
  0x2a   : > { %v471_v40 = vrot.slane %v470_v32, 2  ;;  %v1115_v46 = vadd.f32 %v476_v34, %v475_v31  ;;  %v1118_v50 = vadd.f32 %v547_v36, %v546_v8  ;;  %v610_v54 = vsel %vm408_vm0, %v608_v41, 0.0 }
  0x2b   : > { %v653_v37 = vmul.f32 1.442695, %v1108_v33  ;;  %v542_v18 = vrot.slane %v541_v35, 2  ;;  %v609_v53 = vsel %vm462_vm2, %v606_v38, 0.0  ;;  %v611_v7 = vrot.slane %v610_v54, 4 }
  0x2c   : > { %v1125_v58 = vadd.f32 %v471_v40, %v470_v32  ;;  %v478_v60 = vrot.slane %v1115_v46, 2  ;;  %v617_v9 = vsel %vm408_vm0, %v609_v53, 0.0  ;;  %v677_v1 = vcombine.high %v1108_v33, %v1108_v33 }
  0x2d   : > { %931 = vpow2.f32 %v653_v37  ;;  %v1129_v63 = vadd.f32 %v542_v18, %v541_v35  ;;  %v679_v21 = vsel %vm461_vm1, %v1108_v33, 0.0  ;;  %v612_v28 = vadd.f32 %v611_v7, %v610_v54 }
  0x2e   : > { %v618_v29 = vrot.slane %v617_v9, 4  ;;  %v680_v56 = vsel %vm462_vm2, %v677_v1, 0.0  ;;  %v681_v33 = vsel %vm408_vm0, %v679_v21, 0.0  ;;  %v479_v54 = vadd.f32 %v478_v60, %v1115_v46 }
  0x2f   : > { %v544_v46 = vrot.slane %v1129_v63, 1 }
  0x30   : > { %v619_v10 = vadd.f32 %v618_v29, %v617_v9 }
  0x32   : > { %v926_v39 = vpop.eup %925  ;;  %v620_v7 = vrot.slane %v619_v10, 2 }
  0x33   : > { %v928_v43 = vpop.eup %927  ;;  %v431_v44 = vcombine.high %v926_v39, %v926_v39  ;;  %v433_v45 = vsel %vm408_vm0, %v926_v39, 0.0 }
  0x34   : > { %v434_v47 = vrot.slane %v433_v45, 4  ;;  %v514_v48 = vcombine.high %v928_v43, %v928_v43  ;;  %v516_v49 = vsel %vm408_vm0, %v928_v43, 0.0  ;;  %v621_v1 = vadd.f32 %v620_v7, %v619_v10 }
  0x35   : > { %v440_v51 = vsel %vm408_vm0, %v431_v44, 0.0  ;;  %v517_v52 = vrot.slane %v516_v49, 4  ;;  %v930_v4 = vpop.eup %929 }
  0x36   : > { %v435_v55 = vadd.f32 %v434_v47, %v433_v45  ;;  %v441_v57 = vrot.slane %v440_v51, 4  ;;  %v523_v59 = vsel %vm408_vm0, %v514_v48, 0.0  ;;  %v585_v13 = vcombine.high %v930_v4, %v930_v4 }
  0x37   : > { %v518_v61 = vadd.f32 %v517_v52, %v516_v49  ;;  %v524_v62 = vrot.slane %v523_v59, 4  ;;  %v587_v14 = vsel %vm408_vm0, %v930_v4, 0.0  ;;  %v549_v47 = vrot.slane %v1118_v50, 2 }
  0x38   : > { %v436_v5 = vrot.slane %v435_v55, 2  ;;  %v442_v6 = vadd.f32 %v441_v57, %v440_v51  ;;  %v588_v17 = vrot.slane %v587_v14, 4  ;;  %v594_v20 = vsel %vm408_vm0, %v585_v13, 0.0 }
  0x39   : > { %v519_v11 = vrot.slane %v518_v61, 2  ;;  %v525_v12 = vadd.f32 %v524_v62, %v523_v59  ;;  %v595_v25 = vrot.slane %v594_v20, 4  ;;  %v682_v57 = vrot.slane %v681_v33, 4 }
  0x3a   : > { %v437_v15 = vadd.f32 %v436_v5, %v435_v55  ;;  %v443_v16 = vrot.slane %v442_v6, 2  ;;  %v589_v24 = vadd.f32 %v588_v17, %v587_v14  ;;  %v932_v34 = vpop.eup %931  ;;  %v613_v55 = vrot.slane %v612_v28, 2 }
  0x3b   : > { %v520_v19 = vadd.f32 %v519_v11, %v518_v61  ;;  %v526_v3 = vrot.slane %v525_v12, 2  ;;  %v596_v32 = vadd.f32 %v595_v25, %v594_v20  ;;  %v656_v41 = vcombine.high %v932_v34, %v932_v34 }
  0x3c   : > { %v438_v22 = vrot.slane %v437_v15, 1  ;;  %v444_v23 = vadd.f32 %v443_v16, %v442_v6  ;;  %v590_v8 = vrot.slane %v589_v24, 2  ;;  %v658_v43 = vsel %vm408_vm0, %v932_v34, 0.0 }
  0x3d   : > { %v521_v26 = vrot.slane %v520_v19, 1  ;;  %v527_v27 = vadd.f32 %v526_v3, %v525_v12  ;;  %v597_v39 = vrot.slane %v596_v32, 2  ;;  %v659_v18 = vrot.slane %v658_v43, 4 }
  0x3e   : > { %v439_v30 = vadd.f32 %v438_v22, %v437_v15  ;;  %v445_v31 = vrot.slane %v444_v23, 1  ;;  %v591_v38 = vadd.f32 %v590_v8, %v589_v24  ;;  %v665_v48 = vsel %vm408_vm0, %v656_v41, 0.0 }
  0x3f   : > { %v522_v35 = vadd.f32 %v521_v26, %v520_v19  ;;  %v528_v36 = vrot.slane %v527_v27, 1  ;;  %v598_v45 = vadd.f32 %v597_v39, %v596_v32  ;;  %v660_v52 = vadd.f32 %v659_v18, %v658_v43 }
  0x40   : > { %v446_v37 = vadd.f32 %v445_v31, %v444_v23  ;;  %933 = vlog2.f32 %v439_v30  ;;  %v592_v44 = vrot.slane %v591_v38, 1  ;;  %v666_v53 = vrot.slane %v665_v48, 4 }
  0x41   : > { %v529_v40 = vadd.f32 %v528_v36, %v527_v27  ;;  %935 = vlog2.f32 %v522_v35  ;;  %v599_v51 = vrot.slane %v598_v45, 1  ;;  %v688_v59 = vsel %vm408_vm0, %v680_v56, 0.0 }
  0x42   : > { %937 = vlog2.f32 %v446_v37  ;;  %v593_v49 = vadd.f32 %v592_v44, %v591_v38  ;;  %v661_v62 = vrot.slane %v660_v52, 2  ;;  %v667_v4 = vadd.f32 %v666_v53, %v665_v48 }
  0x43   : > { %939 = vlog2.f32 %v529_v40  ;;  %v600_v61 = vadd.f32 %v599_v51, %v598_v45  ;;  %v473_v5 = vrot.slane %v1125_v58, 1  ;;  %v550_v6 = vadd.f32 %v549_v47, %v1118_v50 }
  0x44   : > { %941 = vlog2.f32 %v593_v49  ;;  %v662_v9 = vadd.f32 %v661_v62, %v660_v52  ;;  %v668_v11 = vrot.slane %v667_v4, 2  ;;  %v689_v12 = vrot.slane %v688_v59, 4 }
  0x45   : > { %943 = vlog2.f32 %v600_v61  ;;  %v480_v13 = vrot.slane %v479_v54, 1  ;;  %v683_v60 = vadd.f32 %v682_v57, %v681_v33  ;;  %v614_v14 = vadd.f32 %v613_v55, %v612_v28 }
  0x46   : > { %v663_v15 = vrot.slane %v662_v9, 1  ;;  %v669_v16 = vadd.f32 %v668_v11, %v667_v4  ;;  %v551_v17 = vrot.slane %v550_v6, 1  ;;  %v474_v19 = vadd.f32 %v473_v5, %v1125_v58 }
  0x47   : > { %v690_v21 = vadd.f32 %v689_v12, %v688_v59  ;;  %v481_v22 = vadd.f32 %v480_v13, %v479_v54  ;;  %v545_v23 = vadd.f32 %v544_v46, %v1129_v63  ;;  %v684_v24 = vrot.slane %v683_v60, 2 }
  0x48   : > { %v664_v3 = vadd.f32 %v663_v15, %v662_v9  ;;  %v670_v20 = vrot.slane %v669_v16, 1  ;;  %v615_v27 = vrot.slane %v614_v14, 1  ;;  %v552_v31 = vadd.f32 %v551_v17, %v550_v6 }
  0x49   : > { %v622_v8 = vrot.slane %v621_v1, 1  ;;  %v691_v35 = vrot.slane %v690_v21, 2  ;;  %v685_v33 = vadd.f32 %v684_v24, %v683_v60  ;;  %v973_v62 = vmov 1966171168  }
  0x4a   : > { %v671_v29 = vadd.f32 %v670_v20, %v669_v16  ;;  %945 = vlog2.f32 %v664_v3  ;;  %v616_v63 = vadd.f32 %v615_v27, %v614_v14  ;;  %v703_v4 = vunpack.c.l.s4 %v973_v62 }
  0x4b   : > { %v623_v40 = vadd.f32 %v622_v8, %v621_v1  ;;  %v692_v45 = vadd.f32 %v691_v35, %v690_v21  ;;  %v686_v47 = vrot.slane %v685_v33, 1 }
  0x4c   : > { %947 = vlog2.f32 %v671_v29  ;;  %v704_v60 = vunpack.c.0.s8 %v703_v4 }
  0x4d   : > { %v934_v50 = vpop.eup %933  ;;  %v693_v55 = vrot.slane %v692_v45, 1  ;;  %v687_v61 = vadd.f32 %v686_v47, %v685_v33 }
  0x4e   : > { %v936_v25 = vpop.eup %935  ;;  %v448_v26 = vmul.f32 0.6931472, %v934_v50  ;;  %v707_v17 = vsub.s32 %v704_v60, %v1037_v2 }
  0x4f   : > { %v938_v28 = vpop.eup %937  ;;  %v531_v30 = vmul.f32 0.6931472, %v936_v25  ;;  %v694_v9 = vadd.f32 %v693_v55, %v692_v45 }
  0x50   : > { %v940_v32 = vpop.eup %939  ;;  %v450_v34 = vmul.f32 0.6931472, %v938_v28  ;;  %v482_v58 = vsub.f32 %v448_v26, %v474_v19 }
  0x51   : > { %v533_v36 = vmul.f32 0.6931472, %v940_v32  ;;  %v553_v56 = vsub.f32 %v531_v30, %v545_v23  ;;  %v942_v38 = vpop.eup %941 }
  0x52   : > { %v483_v37 = vsub.f32 %v450_v34, %v481_v22  ;;  %v484_v41 = vmul.f32 0.5, %v482_v58  ;;  %v602_v44 = vmul.f32 0.6931472, %v942_v38  ;;  %v944_v18 = vpop.eup %943 }
  0x53   : > { %v554_v39 = vsub.f32 %v533_v36, %v552_v31  ;;  %v555_v43 = vmul.f32 0.75, %v553_v56  ;;  %v604_v49 = vmul.f32 0.6931472, %v944_v18 }
  0x54   : > { %v485_v10 = vmul.f32 0.5, %v483_v37  ;;  %v624_v51 = vsub.f32 %v602_v44, %v616_v63 }
  0x55   : > { %v556_v48 = vmul.f32 0.75, %v554_v39  ;;  %v557_v52 = vadd.f32 %v555_v43, %v484_v41  ;;  %v625_v53 = vsub.f32 %v604_v49, %v623_v40 }
  0x56   : > { %v626_v54 = vmul.f32 0.875, %v624_v51 }
  0x57   : > { %v558_v57 = vadd.f32 %v556_v48, %v485_v10  ;;  %v627_v59 = vmul.f32 0.875, %v625_v53  ;;  %v946_v5 = vpop.eup %945 }
  0x58   : > { %v628_v6 = vadd.f32 %v626_v54, %v557_v52  ;;  %v673_v7 = vmul.f32 0.6931472, %v946_v5 }
  0x59   : > { %v948_v11 = vpop.eup %947  ;;  %v629_v12 = vadd.f32 %v627_v59, %v558_v57 }
  0x5a   : > { %v675_v13 = vmul.f32 0.6931472, %v948_v11  ;;  %v695_v46 = vsub.f32 %v673_v7, %v687_v61 }
  0x5c   : > { %v696_v14 = vsub.f32 %v675_v13, %v694_v9  ;;  %v697_v15 = vadd.f32 %v695_v46, %v628_v6 }
  0x5e   : > { %v698_v16 = vadd.f32 %v696_v14, %v629_v12 }
  0x60   : > { %v701_v1 = vcombine.low %v697_v15, %v698_v16 }
  0x62   : > { %v708_v19 = vrot.slane %v701_v1, %v707_v17 }
  0x64   : > { %v715_v3 = vrot.slane %v708_v19, %v707_v17 }
  0x66   : > { %v717_v20 = vsel %vm403_vm3, %v715_v3, 0.0 }
  0x67   : > { %722 = vst.msk [vmem:[%s401_s16] sm:$0x3] %vm720_vm4, %v717_v20 }
  0x68 PF: > { %s15_s20 = sadd.s32 1, %s971_s20   ;;  %s1177_s18 = smov %s967_s19 }
  0x69   : > { %p12_p5 = scmp.ge.s32.totalorder %s15_s20, 4   ;;  %s1178_s19 = smov %s1180_s21 }
  0x6b   :  { %14 = sbr.rel (!%p12_p5) target bundleno = 2 (0x2), region = 82 }

</bundles_post_ra>
